<compile_context>
chip_gen: v6e
topology: v6e:2x2x1
jax: 0.10.0
libtpu: 0.0.40
codegen_flags: <defaults>
</compile_context>

<pallas_src>
import functools

import jax
import jax.numpy as jnp
import numpy as np
from jax.experimental import pallas as pl
from jax.experimental.pallas import tpu as pltpu


# ---------------------------------------------------------------------------
# Pallas kernel
# ---------------------------------------------------------------------------
def head_kernel(xw_ref,      # (C+1, TB, 8*S)  channel-tiled input (+ ones/bias channel)
                ww_ref,      # (C+1, 1,  8*S)  per-channel broadcast conv weights (+bias)
                wcomb_ref,   # (8*S, FW)       fused FC weights: value-fc1 | policy-fc
                misc_ref,    # (2, FW)         row0 = fused bias, row1 = [wv2 | bv2 | 0]
                out_ref,     # (TB, OUT_W)     lane-dense slab: pol in [0,P), val at lane P
                *, p_out, vh):
    tb, out_w = out_ref.shape

    # conv1x1 + BN(folded) + ReLU as per-input-channel VPU FMAs.  The result is already
    # the channel-major flattened activation (tb, 8*S): act[b, o*S+s].
    act = jnp.maximum(jnp.sum(xw_ref[...] * ww_ref[...], axis=0), 0.0)        # (tb, 8S)

    # One batched MXU matmul for policy-FC and value-FC1 together.
    fused = jnp.dot(act, wcomb_ref[...], preferred_element_type=jnp.float32)  # (tb, FW)
    fused = fused + misc_ref[0:1, :]                                          # + biases

    h = jnp.maximum(fused[:, :vh], 0.0)         # (tb, 256)  value hidden (ReLU)
    pol = fused[:, vh:]                         # (tb, OUT_W) policy logits (zero-padded)

    # value FC2 (256 -> 1) on the VPU + lane reduce, then tanh on the EUP.
    w2 = misc_ref[1:2, 0:vh]                    # (1, 256)
    b2 = misc_ref[1:2, vh:vh + 1]               # (1, 1)
    val = jnp.tanh(jnp.sum(h * w2, axis=-1, keepdims=True) + b2)              # (tb, 1)

    # Lane-dense output slab: policy in lanes [0, P), value injected at lane P
    # (those policy lanes are exactly zero by construction of wcomb / bias).
    lane = jax.lax.broadcasted_iota(jnp.int32, (tb, out_w), 1)
    out_ref[...] = pol + jnp.where(lane == p_out, val, 0.0)


# ---------------------------------------------------------------------------
# Wrapper: parameter layout glue + pallas_call
# ---------------------------------------------------------------------------
def _batch_tile(batch):
    # Whole-batch block for small B (sub-8 blocks would violate the (8,128) sublane
    # rule); for large B tile in multiples of 8 so the batch grid axis can be marked
    # "parallel" (v7x megacore) while keeping VMEM residency bounded.
    if batch <= 8 or batch % 8 != 0:
        return batch
    tb = 8
    while batch % (tb * 2) == 0 and tb < 64:
        tb *= 2
    return tb


@jax.jit
def head_forward_pallas(x_nchw, prm):
    B, C, H, W = x_nchw.shape
    S = H * W
    P = prm["wfc_p"].shape[0]
    VH = prm["wfc_v1"].shape[0]                       # 256
    NCH = 8                                           # 6 policy + 1 value + 1 pad channel
    FLAT = NCH * S
    OUT_W = ((P + 1 + 127) // 128) * 128              # lane-dense output slab width
    FW = VH + OUT_W
    eps = 1e-5
    f32 = jnp.float32

    # ---- fold BatchNorm (eval mode) into the 1x1 conv weights / bias ----
    sp = prm["bn_p_gamma"] / jnp.sqrt(prm["bn_p_var"] + eps)
    bp = prm["bn_p_beta"] - prm["bn_p_mean"] * sp
    sv = prm["bn_v_gamma"] / jnp.sqrt(prm["bn_v_var"] + eps)
    bv = prm["bn_v_beta"] - prm["bn_v_mean"] * sv
    wc = jnp.concatenate([sp[:, None] * prm["wconv_p"],
                          sv[:, None] * prm["wconv_v"],
                          jnp.zeros((1, C), f32)], axis=0)              # (8, C)
    bc = jnp.concatenate([bp, bv, jnp.zeros((1,), f32)])                # (8,)

    # ---- channel-tiled input + per-channel broadcast conv weights ----
    # xw[c, b, o*S+s] = x[b, c, s];   extra channel of ones carries the conv bias.
    # ww[c, 0, o*S+s] = wc[o, c];     extra row = bc[o].
    x_cbs = jnp.transpose(x_nchw.reshape(B, C, S).astype(f32), (1, 0, 2))      # (C,B,S)
    xw = jnp.concatenate([jnp.tile(x_cbs, (1, 1, NCH)),
                          jnp.ones((1, B, FLAT), f32)], axis=0)                # (C+1,B,FLAT)
    ww = jnp.concatenate([jnp.repeat(wc.T, S, axis=1),
                          jnp.repeat(bc, S)[None, :]], axis=0)[:, None, :]     # (C+1,1,FLAT)

    # ---- fused FC weights: value-fc1 in columns [0:VH], policy-fc in [VH:VH+P] ----
    wcomb = jnp.zeros((FLAT, FW), f32)
    wcomb = wcomb.at[6 * S:7 * S, 0:VH].set(prm["wfc_v1"].T)         # value conv channel
    wcomb = wcomb.at[0:6 * S, VH:VH + P].set(prm["wfc_p"].T)         # policy channels 0..5
    misc = jnp.zeros((2, FW), f32)
    misc = misc.at[0, 0:VH].set(prm["bfc_v1"])
    misc = misc.at[0, VH:VH + P].set(prm["bfc_p"])
    misc = misc.at[1, 0:VH].set(prm["wfc_v2"].reshape(VH))
    misc = misc.at[1, VH].set(prm["bfc_v2"][0])

    TB = _batch_tile(B)
    kernel = functools.partial(head_kernel, p_out=P, vh=VH)
    out = pl.pallas_call(
        kernel,
        out_shape=jax.ShapeDtypeStruct((B, OUT_W), f32),
        grid_spec=pltpu.PrefetchScalarGridSpec(
            num_scalar_prefetch=0,
            grid=(B // TB,),
            in_specs=[
                pl.BlockSpec((C + 1, TB, FLAT), lambda i: (0, i, 0)),   # batch-tiled input
                pl.BlockSpec((C + 1, 1, FLAT), lambda i: (0, 0, 0)),    # conv weights
                pl.BlockSpec((FLAT, FW), lambda i: (0, 0)),             # fused FC weights
                pl.BlockSpec((2, FW), lambda i: (0, 0)),                # packed biases/wv2
            ],
            out_specs=pl.BlockSpec((TB, OUT_W), lambda i: (i, 0)),
        ),
        compiler_params=pltpu.CompilerParams(dimension_semantics=("parallel",)),
    )(xw, ww, wcomb, misc)

    return out[:, :P], out[:, P:P + 1]


# ---------------------------------------------------------------------------
# High-precision NumPy reference (mirrors the PyTorch forward, NCHW, eval-mode BN)
# ---------------------------------------------------------------------------
def head_reference(x, prm):
    x = np.asarray(x, np.float64)
    p = {k: np.asarray(v, np.float64) for k, v in prm.items()}
    B = x.shape[0]
    eps = 1e-5

    def convblock(w, gamma, beta, rm, rv):
        y = np.einsum("oc,bchw->bohw", w, x)
        y = (y - rm[None, :, None, None]) / np.sqrt(rv + eps)[None, :, None, None]
        y = y * gamma[None, :, None, None] + beta[None, :, None, None]
        return np.maximum(y, 0.0)

    pc = convblock(p["wconv_p"], p["bn_p_gamma"], p["bn_p_beta"], p["bn_p_mean"], p["bn_p_var"])
    pol = pc.reshape(B, -1) @ p["wfc_p"].T + p["bfc_p"]

    vc = convblock(p["wconv_v"], p["bn_v_gamma"], p["bn_v_beta"], p["bn_v_mean"], p["bn_v_var"])
    h = np.maximum(vc.reshape(B, -1) @ p["wfc_v1"].T + p["bfc_v1"], 0.0)
    val = np.tanh(h @ p["wfc_v2"].T + p["bfc_v2"])
    return pol, val


def init_params(key, residual_channels, input_size, policy_size):
    C, S, P = residual_channels, input_size, policy_size
    ks = jax.random.split(key, 8)

    def uniform(k, shape, fan_in):
        bound = 1.0 / np.sqrt(fan_in)
        return jax.random.uniform(k, shape, jnp.float32, -bound, bound)

    return {
        # conv1x1 weights (kaiming_normal_, fan_out, relu)
        "wconv_p": jax.random.normal(ks[0], (6, C), jnp.float32) * np.sqrt(2.0 / 6.0),
        "wconv_v": jax.random.normal(ks[1], (1, C), jnp.float32) * np.sqrt(2.0 / 1.0),
        # BatchNorm2d defaults (eval mode)
        "bn_p_gamma": jnp.ones((6,), jnp.float32), "bn_p_beta": jnp.zeros((6,), jnp.float32),
        "bn_p_mean": jnp.zeros((6,), jnp.float32), "bn_p_var": jnp.ones((6,), jnp.float32),
        "bn_v_gamma": jnp.ones((1,), jnp.float32), "bn_v_beta": jnp.zeros((1,), jnp.float32),
        "bn_v_mean": jnp.zeros((1,), jnp.float32), "bn_v_var": jnp.ones((1,), jnp.float32),
        # Linear layers (PyTorch default uniform init)
        "wfc_p": uniform(ks[2], (P, 6 * S), 6 * S),
        "bfc_p": uniform(ks[3], (P,), 6 * S),
        "wfc_v1": uniform(ks[4], (256, S), S),
        "bfc_v1": uniform(ks[5], (256,), S),
        "wfc_v2": uniform(ks[6], (1, 256), 256),
        "bfc_v2": uniform(ks[7], (1,), 256),
    }


if __name__ == "__main__":
    B, C, H, W = 2, 8, 8, 8          # residual_channels=8, input_size=H*W=64
    policy_size = 16

    key = jax.random.PRNGKey(0)
    kx, kp = jax.random.split(key)
    x = jax.random.normal(kx, (B, C, H, W), jnp.float32)
    params = init_params(kp, C, H * W, policy_size)

    pol, val = head_forward_pallas(x, params)
    pol, val = jax.block_until_ready(pol), jax.block_until_ready(val)

    pol_ref, val_ref = head_reference(x, params)
    # default (bf16 MXU pass) matmul precision in-kernel vs float64 reference
    np.testing.assert_allclose(np.asarray(pol), pol_ref, rtol=2e-2, atol=2e-2)
    np.testing.assert_allclose(np.asarray(val), val_ref, rtol=2e-2, atol=2e-2)
    assert pol.shape == (B, policy_size) and val.shape == (B, 1)

    print("KERNEL_OK")
</pallas_src>

<mosaic_0001>
module attributes {stable_mosaic.version = 11 : i64} {
  func.func @head_kernel(%arg0: i32, %arg1: memref<9x2x512xf32, #tpu.memory_space<vmem>>, %arg2: memref<9x1x512xf32, #tpu.memory_space<vmem>>, %arg3: memref<512x384xf32, #tpu.memory_space<vmem>>, %arg4: memref<2x384xf32, #tpu.memory_space<vmem>>, %arg5: memref<2x128xf32, #tpu.memory_space<vmem>>) attributes {dimension_semantics = [#tpu.dimension_semantics<parallel>], iteration_bounds = array<i64: 1>, scalar_prefetch = 0 : i64, scratch_operands = 0 : i64, tpu.core_type = #tpu.core_type<tc>, window_params = [{transform_indices = @transform_0, window_bounds = array<i64: 9, 2, 512>}, {pipeline_mode = #tpu.pipeline_mode<synchronous>, transform_indices = @transform_1, window_bounds = array<i64: 9, 1, 512>}, {pipeline_mode = #tpu.pipeline_mode<synchronous>, transform_indices = @transform_2, window_bounds = array<i64: 512, 384>}, {pipeline_mode = #tpu.pipeline_mode<synchronous>, transform_indices = @transform_3, window_bounds = array<i64: 2, 384>}, {transform_indices = @transform_4, window_bounds = array<i64: 2, 128>}]} {
    %c0 = arith.constant 0 : index
    %c0_0 = arith.constant 0 : index
    %c0_1 = arith.constant 0 : index
    %0 = vector.load %arg1[%c0, %c0_0, %c0_1] : memref<9x2x512xf32, #tpu.memory_space<vmem>>, vector<9x2x512xf32>
    %c0_2 = arith.constant 0 : index
    %c0_3 = arith.constant 0 : index
    %c0_4 = arith.constant 0 : index
    %1 = vector.load %arg2[%c0_2, %c0_3, %c0_4] : memref<9x1x512xf32, #tpu.memory_space<vmem>>, vector<9x1x512xf32>
    %2 = vector.broadcast %1 : vector<9x1x512xf32> to vector<9x2x512xf32>
    %3 = arith.mulf %0, %2 : vector<9x2x512xf32>
    %cst = arith.constant dense<0.000000e+00> : vector<2x512xf32>
    %4 = vector.multi_reduction <add>, %3, %cst [0] : vector<9x2x512xf32> to vector<2x512xf32>
    %cst_5 = arith.constant 0.000000e+00 : f32
    %5 = vector.broadcast %cst_5 : f32 to vector<2x512xf32>
    %6 = arith.maximumf %4, %5 : vector<2x512xf32>
    %c0_6 = arith.constant 0 : index
    %c0_7 = arith.constant 0 : index
    %7 = vector.load %arg3[%c0_6, %c0_7] : memref<512x384xf32, #tpu.memory_space<vmem>>, vector<512x384xf32>
    %cst_8 = arith.constant dense<0.000000e+00> : vector<2x384xf32>
    %8 = tpu.matmul %6, %7, %cst_8 {dimension_numbers = #tpu.dot_dimension_numbers<[1], [0], [0], [1], [0, 0, 1, 1], [], []>} : vector<2x512xf32>, vector<512x384xf32>, vector<2x384xf32> -> vector<2x384xf32>
    %c0_9 = arith.constant 0 : index
    %c0_10 = arith.constant 0 : index
    %9 = vector.load %arg4[%c0_9, %c0_10] : memref<2x384xf32, #tpu.memory_space<vmem>>, vector<1x384xf32>
    %10 = vector.broadcast %9 : vector<1x384xf32> to vector<2x384xf32>
    %11 = arith.addf %8, %10 : vector<2x384xf32>
    %12 = vector.extract_strided_slice %11 {offsets = [0, 0], sizes = [2, 256], strides = [1, 1]} : vector<2x384xf32> to vector<2x256xf32>
    %cst_11 = arith.constant 0.000000e+00 : f32
    %13 = vector.broadcast %cst_11 : f32 to vector<2x256xf32>
    %14 = arith.maximumf %12, %13 : vector<2x256xf32>
    %15 = vector.extract_strided_slice %11 {offsets = [0, 256], sizes = [2, 128], strides = [1, 1]} : vector<2x384xf32> to vector<2x128xf32>
    %c1 = arith.constant 1 : index
    %c0_12 = arith.constant 0 : index
    %16 = vector.load %arg4[%c1, %c0_12] : memref<2x384xf32, #tpu.memory_space<vmem>>, vector<1x256xf32>
    %c1_13 = arith.constant 1 : index
    %c256 = arith.constant 256 : index
    %17 = vector.load %arg4[%c1_13, %c256] : memref<2x384xf32, #tpu.memory_space<vmem>>, vector<1x1xf32>
    %18 = vector.broadcast %16 : vector<1x256xf32> to vector<2x256xf32>
    %19 = arith.mulf %14, %18 : vector<2x256xf32>
    %cst_14 = arith.constant dense<0.000000e+00> : vector<2xf32>
    %20 = vector.multi_reduction <add>, %19, %cst_14 [1] : vector<2x256xf32> to vector<2xf32>
    %21 = vector.shape_cast %20 : vector<2xf32> to vector<2x1xf32>
    %22 = vector.broadcast %17 : vector<1x1xf32> to vector<2x1xf32>
    %23 = arith.addf %21, %22 : vector<2x1xf32>
    %24 = math.tanh %23 : vector<2x1xf32>
    %25 = tpu.iota {dimensions = array<i32: 1>} : vector<2x128xi32>
    %c16_i32 = arith.constant 16 : i32
    %26 = vector.broadcast %c16_i32 : i32 to vector<2x128xi32>
    %27 = arith.cmpi eq, %25, %26 : vector<2x128xi32>
    %cst_15 = arith.constant 0.000000e+00 : f32
    %28 = vector.shape_cast %24 : vector<2x1xf32> to vector<2x1xf32>
    %29 = vector.broadcast %28 : vector<2x1xf32> to vector<2x128xf32>
    %30 = vector.broadcast %cst_15 : f32 to vector<2x128xf32>
    %31 = arith.select %27, %29, %30 : vector<2x128xi1>, vector<2x128xf32>
    %32 = arith.addf %15, %31 : vector<2x128xf32>
    %c0_16 = arith.constant 0 : index
    %c0_17 = arith.constant 0 : index
    %33 = vector.load %arg5[%c0_16, %c0_17] : memref<2x128xf32, #tpu.memory_space<vmem>>, vector<2x128xf32>
    tpu.vector_store %arg5[%c0_16, %c0_17], %32 {strides = array<i32>} : memref<2x128xf32, #tpu.memory_space<vmem>>, vector<2x128xf32>,
    return
  }
  func.func @transform_0(%arg0: i32) -> (i32, i32, i32) {
    %c0_i32 = arith.constant 0 : i32
    %c0_i32_0 = arith.constant 0 : i32
    %c0_i32_1 = arith.constant 0 : i32
    return %c0_i32, %arg0, %c0_i32_0 : i32, i32, i32
  }
  func.func @transform_1(%arg0: i32) -> (i32, i32, i32) {
    %c0_i32 = arith.constant 0 : i32
    %c0_i32_0 = arith.constant 0 : i32
    %c0_i32_1 = arith.constant 0 : i32
    %c0_i32_2 = arith.constant 0 : i32
    return %c0_i32, %c0_i32_0, %c0_i32_1 : i32, i32, i32
  }
  func.func @transform_2(%arg0: i32) -> (i32, i32) {
    %c0_i32 = arith.constant 0 : i32
    %c0_i32_0 = arith.constant 0 : i32
    %c0_i32_1 = arith.constant 0 : i32
    return %c0_i32, %c0_i32_0 : i32, i32
  }
  func.func @transform_3(%arg0: i32) -> (i32, i32) {
    %c0_i32 = arith.constant 0 : i32
    %c0_i32_0 = arith.constant 0 : i32
    %c0_i32_1 = arith.constant 0 : i32
    return %c0_i32, %c0_i32_0 : i32, i32
  }
  func.func @transform_4(%arg0: i32) -> (i32, i32) {
    %c0_i32 = arith.constant 0 : i32
    %c0_i32_0 = arith.constant 0 : i32
    return %arg0, %c0_i32 : i32, i32
  }
}

</mosaic_0001>

<bundles_post_ra>
// kernel: tile.9
= control target key start
LH: loop header
LB: loop body
LE: loop exit
PB: predicated region body
PF: predicated region fallthrough
CT: control target
= control target key end

     0   :  { %s460_s8 = smov 64   ;;  %vm3_vm0 = vcmask 523264   ;;  %vm60_vm1 = vcmask 1048064   ;;  %s671_s0 = inlined_call_operand.vmem [shape: f32[8,2,8,64], index: 0, kind: input, shape index: {}]   ;;  %s672_s1 = inlined_call_operand.vmem [shape: f32[8,2,512], index: 1, kind: output, shape index: {}]  }
   0x1   :  { %v422_v0 = vld.sshfl [vmem:[%s671_s0 + $0x21] sm:$0xff pattern:$0xe6c4a280]   ;;  %v423_v2 = vld.sshfl [vmem:[%s671_s0 + $0x31] sm:$0xff pattern:$0xe6c4a280]  }
   0x2   :  { %83 = vrot.lane.b32.xlu1 %v422_v0, %s460_s8  ;;  %v420_v1 = vld.sshfl [vmem:[%s671_s0 + $0x1] sm:$0xff pattern:$0xe6c4a280]   ;;  %v421_v3 = vld.sshfl [vmem:[%s671_s0 + $0x11] sm:$0xff pattern:$0xe6c4a280]  }
   0x3   :  { %58 = vrot.lane.b32.xlu0 %v420_v1, %s460_s8  ;;  %v425_v4 = vld.sshfl [vmem:[%s671_s0 + $0x51] sm:$0xff pattern:$0xe6c4a280]   ;;  %v414_v5 = vld [vmem:[%s671_s0 + $0x20] ss:$2 sm:$0xff]  }
   0x4   :  { %18 = vst.msk [vmem:[#allocation0 + $0x40] ss:$8 sm:$0xf] %vm3_vm0, %v414_v5   ;;  %20 = vst.msk [vmem:[#allocation0 + $0x21] ss:$8 sm:$0xf0] %vm3_vm0, %v414_v5  }
   0x5   :  { %v2_v6 = vld [vmem:[%s671_s0] ss:$2 sm:$0xff]   ;;  %v415_v7 = vld [vmem:[%s671_s0 + $0x30] ss:$2 sm:$0xff]  }
   0x6   :  { %96 = vrot.lane.b32.xlu1 %v423_v2, %s460_s8  ;;  %v413_v8 = vld [vmem:[%s671_s0 + $0x10] ss:$2 sm:$0xff]   ;;  %4 = vst.msk [vmem:[#allocation0] ss:$8 sm:$0xf] %vm3_vm0, %v2_v6  }
   0x7   :  { %70 = vrot.lane.b32.xlu0 %v421_v3, %s460_s8  ;;  %6 = vst.msk [vmem:[#allocation0 - $0x1f] ss:$8 sm:$0xf0] %vm3_vm0, %v2_v6   ;;  %25 = vst.msk [vmem:[#allocation0 + $0x60] ss:$8 sm:$0xf] %vm3_vm0, %v415_v7  }
   0x8   :  { %27 = vst.msk [vmem:[#allocation0 + $0x41] ss:$8 sm:$0xf0] %vm3_vm0, %v415_v7   ;;  %11 = vst.msk [vmem:[#allocation0 + $0x20] ss:$8 sm:$0xf] %vm3_vm0, %v413_v8  }
   0x9   :  { %13 = vst.msk [vmem:[#allocation0 + $0x1] ss:$8 sm:$0xf0] %vm3_vm0, %v413_v8   ;;  %v417_v9 = vld [vmem:[%s671_s0 + $0x50] ss:$2 sm:$0xff]  }
   0xa   :  { %v416_v10 = vld [vmem:[%s671_s0 + $0x40] ss:$2 sm:$0xff]   ;;  %v419_v11 = vld [vmem:[%s671_s0 + $0x70] ss:$2 sm:$0xff]   ;;  %122 = vrot.lane.b32.xlu1 %v425_v4, %s460_s8 }
   0xb   :  { %v424_v12 = vld.sshfl [vmem:[%s671_s0 + $0x41] sm:$0xff pattern:$0xe6c4a280]   ;;  %39 = vst.msk [vmem:[#allocation0 + $0xa0] ss:$8 sm:$0xf] %vm3_vm0, %v417_v9  }
   0xc   :  { %41 = vst.msk [vmem:[#allocation0 + $0x81] ss:$8 sm:$0xf0] %vm3_vm0, %v417_v9   ;;  %32 = vst.msk [vmem:[#allocation0 + $0x80] ss:$8 sm:$0xf] %vm3_vm0, %v416_v10   ;;  %109 = vrot.lane.b32.xlu0 %v424_v12, %s460_s8 }
   0xd   :  { %34 = vst.msk [vmem:[#allocation0 + $0x61] ss:$8 sm:$0xf0] %vm3_vm0, %v416_v10   ;;  %53 = vst.msk [vmem:[#allocation0 + $0xe0] ss:$8 sm:$0xf] %vm3_vm0, %v419_v11  }
   0xe   :  { %55 = vst.msk [vmem:[#allocation0 + $0xc1] ss:$8 sm:$0xf0] %vm3_vm0, %v419_v11   ;;  %v418_v13 = vld [vmem:[%s671_s0 + $0x60] ss:$2 sm:$0xff]  }
   0xf   :  { %46 = vst.msk [vmem:[#allocation0 + $0xc0] ss:$8 sm:$0xf] %vm3_vm0, %v418_v13   ;;  %48 = vst.msk [vmem:[#allocation0 + $0xa1] ss:$8 sm:$0xf0] %vm3_vm0, %v418_v13  }
  0x10   :  { %v427_v14 = vld.sshfl [vmem:[%s671_s0 + $0x71] sm:$0xff pattern:$0xe6c4a280]   ;;  %v426_v15 = vld.sshfl [vmem:[%s671_s0 + $0x61] sm:$0xff pattern:$0xe6c4a280]  }
  0x11   :  { %148 = vrot.lane.b32.xlu1 %v427_v14, %s460_s8  ;;  %135 = vrot.lane.b32.xlu0 %v426_v15, %s460_s8 }
  0x74   :  { %v84_v16 = vpop.permute.xlu1 %83  }
  0x75   :  { %87 = vst.msk [vmem:[#allocation0 + $0x40] sm:$0x3] %vm60_vm1, %v84_v16   ;;  %89 = vst.msk [vmem:[#allocation0 + $0x46] sm:$0xc] %vm60_vm1, %v84_v16   ;;  %v59_v17 = vpop.permute.xlu0 %58  }
  0x76   :  { %91 = vst.msk [vmem:[#allocation0 + $0x4c] sm:$0x30] %vm60_vm1, %v84_v16   ;;  %93 = vst.msk [vmem:[#allocation0 + $0x52] sm:$0xc0] %vm60_vm1, %v84_v16  }
  0x77   :  { %61 = vst.msk [vmem:[#allocation0] sm:$0x3] %vm60_vm1, %v59_v17   ;;  %63 = vst.msk [vmem:[#allocation0 + $0x6] sm:$0xc] %vm60_vm1, %v59_v17  }
  0x78   :  { %65 = vst.msk [vmem:[#allocation0 + $0xc] sm:$0x30] %vm60_vm1, %v59_v17   ;;  %67 = vst.msk [vmem:[#allocation0 + $0x12] sm:$0xc0] %vm60_vm1, %v59_v17   ;;  %v97_v18 = vpop.permute.xlu1 %96  }
  0x79   :  { %100 = vst.msk [vmem:[#allocation0 + $0x60] sm:$0x3] %vm60_vm1, %v97_v18   ;;  %102 = vst.msk [vmem:[#allocation0 + $0x66] sm:$0xc] %vm60_vm1, %v97_v18   ;;  %v71_v19 = vpop.permute.xlu0 %70  }
  0x7a   :  { %104 = vst.msk [vmem:[#allocation0 + $0x6c] sm:$0x30] %vm60_vm1, %v97_v18   ;;  %106 = vst.msk [vmem:[#allocation0 + $0x72] sm:$0xc0] %vm60_vm1, %v97_v18  }
  0x7b   :  { %74 = vst.msk [vmem:[#allocation0 + $0x20] sm:$0x3] %vm60_vm1, %v71_v19   ;;  %76 = vst.msk [vmem:[#allocation0 + $0x26] sm:$0xc] %vm60_vm1, %v71_v19  }
  0x7c   :  { %78 = vst.msk [vmem:[#allocation0 + $0x2c] sm:$0x30] %vm60_vm1, %v71_v19   ;;  %80 = vst.msk [vmem:[#allocation0 + $0x32] sm:$0xc0] %vm60_vm1, %v71_v19   ;;  %v216_v20 = vld [vmem:[#allocation0 + $0x40] sm:$0x3]  ;;  %v123_v23 = vpop.permute.xlu1 %122  }
  0x7d   :  { %v223_v21 = vld [vmem:[#allocation0 + $0x48] sm:$0x3]  ;;  %v230_v22 = vld [vmem:[#allocation0 + $0x50] sm:$0x3]  ;;  %435 = vst [vmem:[%s672_s1 + $0x10] sm:$0x3] %v216_v20 }
  0x7e   :  { %436 = vst [vmem:[%s672_s1 + $0x12] sm:$0x3] %v223_v21  ;;  %437 = vst [vmem:[%s672_s1 + $0x14] sm:$0x3] %v230_v22  ;;  %v237_v24 = vld [vmem:[#allocation0 + $0x58] sm:$0x3]  ;;  %v110_v27 = vpop.permute.xlu0 %109  }
  0x7f   :  { %v163_v25 = vld [vmem:[#allocation0] sm:$0x3]  ;;  %v168_v26 = vld [vmem:[#allocation0 + $0x8] sm:$0x3]  ;;  %126 = vst.msk [vmem:[#allocation0 + $0xa0] sm:$0x3] %vm60_vm1, %v123_v23  }
  0x80   :  { %128 = vst.msk [vmem:[#allocation0 + $0xa6] sm:$0xc] %vm60_vm1, %v123_v23   ;;  %130 = vst.msk [vmem:[#allocation0 + $0xac] sm:$0x30] %vm60_vm1, %v123_v23   ;;  %v174_v28 = vld [vmem:[#allocation0 + $0x10] sm:$0x3] }
  0x81   :  { %132 = vst.msk [vmem:[#allocation0 + $0xb2] sm:$0xc0] %vm60_vm1, %v123_v23   ;;  %438 = vst [vmem:[%s672_s1 + $0x16] sm:$0x3] %v237_v24  ;;  %v181_v29 = vld [vmem:[#allocation0 + $0x18] sm:$0x3] }
  0x82   :  { %166 = vst [vmem:[%s672_s1] sm:$0x3] %v163_v25  ;;  %428 = vst [vmem:[%s672_s1 + $0x2] sm:$0x3] %v168_v26  ;;  %v244_v30 = vld [vmem:[#allocation0 + $0x60] sm:$0x3] }
  0x83   :  { %113 = vst.msk [vmem:[#allocation0 + $0x80] sm:$0x3] %vm60_vm1, %v110_v27   ;;  %115 = vst.msk [vmem:[#allocation0 + $0x86] sm:$0xc] %vm60_vm1, %v110_v27   ;;  %v251_v31 = vld [vmem:[#allocation0 + $0x68] sm:$0x3]  ;;  %v149_v33 = vpop.permute.xlu1 %148   ;;  %v136_v37 = vpop.permute.xlu0 %135  }
  0x84   :  { %117 = vst.msk [vmem:[#allocation0 + $0x8c] sm:$0x30] %vm60_vm1, %v110_v27   ;;  %119 = vst.msk [vmem:[#allocation0 + $0x92] sm:$0xc0] %vm60_vm1, %v110_v27   ;;  %v258_v32 = vld [vmem:[#allocation0 + $0x70] sm:$0x3] }
  0x85   :  { %429 = vst [vmem:[%s672_s1 + $0x4] sm:$0x3] %v174_v28  ;;  %430 = vst [vmem:[%s672_s1 + $0x6] sm:$0x3] %v181_v29  ;;  %v265_v34 = vld [vmem:[#allocation0 + $0x78] sm:$0x3] }
  0x86   :  { %439 = vst [vmem:[%s672_s1 + $0x18] sm:$0x3] %v244_v30  ;;  %440 = vst [vmem:[%s672_s1 + $0x1a] sm:$0x3] %v251_v31  ;;  %v188_v35 = vld [vmem:[#allocation0 + $0x20] sm:$0x3] }
  0x87   :  { %441 = vst [vmem:[%s672_s1 + $0x1c] sm:$0x3] %v258_v32  ;;  %v195_v36 = vld [vmem:[#allocation0 + $0x28] sm:$0x3]  ;;  %152 = vst.msk [vmem:[#allocation0 + $0xe0] sm:$0x3] %vm60_vm1, %v149_v33  }
  0x88   :  { %154 = vst.msk [vmem:[#allocation0 + $0xe6] sm:$0xc] %vm60_vm1, %v149_v33   ;;  %156 = vst.msk [vmem:[#allocation0 + $0xec] sm:$0x30] %vm60_vm1, %v149_v33   ;;  %v202_v38 = vld [vmem:[#allocation0 + $0x30] sm:$0x3] }
  0x89   :  { %158 = vst.msk [vmem:[#allocation0 + $0xf2] sm:$0xc0] %vm60_vm1, %v149_v33   ;;  %442 = vst [vmem:[%s672_s1 + $0x1e] sm:$0x3] %v265_v34  ;;  %v209_v39 = vld [vmem:[#allocation0 + $0x38] sm:$0x3] }
  0x8a   :  { %431 = vst [vmem:[%s672_s1 + $0x8] sm:$0x3] %v188_v35  ;;  %432 = vst [vmem:[%s672_s1 + $0xa] sm:$0x3] %v195_v36  ;;  %v300_v40 = vld [vmem:[#allocation0 + $0xa0] sm:$0x3] }
  0x8b   :  { %139 = vst.msk [vmem:[#allocation0 + $0xc0] sm:$0x3] %vm60_vm1, %v136_v37   ;;  %141 = vst.msk [vmem:[#allocation0 + $0xc6] sm:$0xc] %vm60_vm1, %v136_v37   ;;  %v307_v41 = vld [vmem:[#allocation0 + $0xa8] sm:$0x3] }
  0x8c   :  { %143 = vst.msk [vmem:[#allocation0 + $0xcc] sm:$0x30] %vm60_vm1, %v136_v37   ;;  %145 = vst.msk [vmem:[#allocation0 + $0xd2] sm:$0xc0] %vm60_vm1, %v136_v37   ;;  %v314_v42 = vld [vmem:[#allocation0 + $0xb0] sm:$0x3] }
  0x8d   :  { %433 = vst [vmem:[%s672_s1 + $0xc] sm:$0x3] %v202_v38  ;;  %434 = vst [vmem:[%s672_s1 + $0xe] sm:$0x3] %v209_v39  ;;  %v321_v43 = vld [vmem:[#allocation0 + $0xb8] sm:$0x3] }
  0x8e   :  { %447 = vst [vmem:[%s672_s1 + $0x28] sm:$0x3] %v300_v40  ;;  %448 = vst [vmem:[%s672_s1 + $0x2a] sm:$0x3] %v307_v41  ;;  %v272_v44 = vld [vmem:[#allocation0 + $0x80] sm:$0x3] }
  0x8f   :  { %449 = vst [vmem:[%s672_s1 + $0x2c] sm:$0x3] %v314_v42  ;;  %v279_v45 = vld [vmem:[#allocation0 + $0x88] sm:$0x3]  ;;  %450 = vst [vmem:[%s672_s1 + $0x2e] sm:$0x3] %v321_v43 }
  0x90   :  { %443 = vst [vmem:[%s672_s1 + $0x20] sm:$0x3] %v272_v44  ;;  %444 = vst [vmem:[%s672_s1 + $0x22] sm:$0x3] %v279_v45  ;;  %v286_v46 = vld [vmem:[#allocation0 + $0x90] sm:$0x3] }
  0x91   :  { %v293_v47 = vld [vmem:[#allocation0 + $0x98] sm:$0x3]  ;;  %445 = vst [vmem:[%s672_s1 + $0x24] sm:$0x3] %v286_v46  ;;  %v356_v48 = vld [vmem:[#allocation0 + $0xe0] sm:$0x3] }
  0x92   :  { %446 = vst [vmem:[%s672_s1 + $0x26] sm:$0x3] %v293_v47  ;;  %v363_v49 = vld [vmem:[#allocation0 + $0xe8] sm:$0x3]  ;;  %v370_v50 = vld [vmem:[#allocation0 + $0xf0] sm:$0x3] }
  0x93   :  { %455 = vst [vmem:[%s672_s1 + $0x38] sm:$0x3] %v356_v48  ;;  %456 = vst [vmem:[%s672_s1 + $0x3a] sm:$0x3] %v363_v49  ;;  %v377_v51 = vld [vmem:[#allocation0 + $0xf8] sm:$0x3] }
  0x94   :  { %457 = vst [vmem:[%s672_s1 + $0x3c] sm:$0x3] %v370_v50  ;;  %v328_v52 = vld [vmem:[#allocation0 + $0xc0] sm:$0x3]  ;;  %v335_v53 = vld [vmem:[#allocation0 + $0xc8] sm:$0x3] }
  0x95   :  { %458 = vst [vmem:[%s672_s1 + $0x3e] sm:$0x3] %v377_v51  ;;  %451 = vst [vmem:[%s672_s1 + $0x30] sm:$0x3] %v328_v52  ;;  %v342_v54 = vld [vmem:[#allocation0 + $0xd0] sm:$0x3] }
  0x96   :  { %452 = vst [vmem:[%s672_s1 + $0x32] sm:$0x3] %v335_v53  ;;  %v349_v55 = vld [vmem:[#allocation0 + $0xd8] sm:$0x3]  ;;  %453 = vst [vmem:[%s672_s1 + $0x34] sm:$0x3] %v342_v54 }
  0x97   :  { %454 = vst [vmem:[%s672_s1 + $0x36] sm:$0x3] %v349_v55 }

// kernel: head_forward_pallas.1
= control target key start
LH: loop header
LB: loop body
LE: loop exit
PB: predicated region body
PF: predicated region fallthrough
CT: control target
= control target key end

     0   :  { %vm557_vm0 = vcmask 1041408   ;;  %s2259_s2 = inlined_call_operand.vmem [shape: f32[512,384], index: 2, kind: input, shape index: {}]   ;;  %s2260_s1 = inlined_call_operand.vmem [shape: f32[9,1,512], index: 1, kind: input, shape index: {}]   ;;  %s2261_s0 = inlined_call_operand.vmem [shape: f32[9,2,512], index: 0, kind: input, shape index: {}]   ;;  %s2262_s3 = inlined_call_operand.vmem [shape: f32[2,384], index: 3, kind: input, shape index: {}]   ;;  %s2263_s4 = inlined_call_operand.vmem [shape: f32[2,128], index: 4, kind: output, shape index: {}]  }
   0x1   :  { %v676_v0 = vld [vmem:[%s2259_s2 + $0x170] sm:$0xff]  ;;  %v675_v2 = vld [vmem:[%s2259_s2 + $0x168] sm:$0xff]  ;;  %v673_v4 = vld [vmem:[%s2259_s2 + $0x158] sm:$0xff] }
   0x2   :  { %v772_v1 = vld [vmem:[%s2259_s2 + $0x470] sm:$0xff]  ;;  %839 = vmatprep.subr.mxu0 %v676_v0  ;;  %v771_v3 = vld [vmem:[%s2259_s2 + $0x468] sm:$0xff]  ;;  %v769_v5 = vld [vmem:[%s2259_s2 + $0x458] sm:$0xff] }
   0x3   :  { %910 = vmatprep.subr.mxu1 %v772_v1  ;;  %840 = vmatpush1.msra.mxu0 %v675_v2  ;;  %v672_v6 = vld [vmem:[%s2259_s2 + $0x150] sm:$0xff]  ;;  %v670_v8 = vld [vmem:[%s2259_s2 + $0x140] sm:$0xff]  ;;  %v669_v10 = vld [vmem:[%s2259_s2 + $0x138] sm:$0xff] }
   0x4   :  { %911 = vmatpush1.msra.mxu1 %v771_v3  ;;  %v768_v7 = vld [vmem:[%s2259_s2 + $0x450] sm:$0xff]  ;;  %841 = vmatprep.subr.mxu0 %v673_v4  ;;  %v766_v9 = vld [vmem:[%s2259_s2 + $0x440] sm:$0xff]  ;;  %v765_v11 = vld [vmem:[%s2259_s2 + $0x438] sm:$0xff] }
   0x5   :  { %912 = vmatprep.subr.mxu1 %v769_v5  ;;  %842 = vmatpush1.msra.mxu0 %v672_v6  ;;  %v667_v12 = vld [vmem:[%s2259_s2 + $0x128] sm:$0xff]  ;;  %v666_v14 = vld [vmem:[%s2259_s2 + $0x120] sm:$0xff]  ;;  %v664_v16 = vld [vmem:[%s2259_s2 + $0x110] sm:$0xff] }
   0x6   :  { %913 = vmatpush1.msra.mxu1 %v768_v7  ;;  %v763_v13 = vld [vmem:[%s2259_s2 + $0x428] sm:$0xff]  ;;  %843 = vmatprep.subr.mxu0 %v670_v8  ;;  %v762_v15 = vld [vmem:[%s2259_s2 + $0x420] sm:$0xff]  ;;  %v760_v17 = vld [vmem:[%s2259_s2 + $0x410] sm:$0xff] }
   0x7   :  { %914 = vmatprep.subr.mxu1 %v766_v9  ;;  %844 = vmatpush1.msra.mxu0 %v669_v10  ;;  %v663_v18 = vld [vmem:[%s2259_s2 + $0x108] sm:$0xff]  ;;  %v661_v20 = vld [vmem:[%s2259_s2 + $0xf8] sm:$0xff]  ;;  %v660_v22 = vld [vmem:[%s2259_s2 + $0xf0] sm:$0xff]  ;;  %v44_v10 = vlaneseq }
   0x8   :  { %915 = vmatpush1.msra.mxu1 %v765_v11  ;;  %845 = vmatprep.subr.mxu0 %v667_v12  ;;  %v759_v19 = vld [vmem:[%s2259_s2 + $0x408] sm:$0xff]  ;;  %v757_v21 = vld [vmem:[%s2259_s2 + $0x3f8] sm:$0xff]  ;;  %v756_v23 = vld [vmem:[%s2259_s2 + $0x3f0] sm:$0xff] }
   0x9   :  { %916 = vmatprep.subr.mxu1 %v763_v13  ;;  %846 = vmatpush1.msra.mxu0 %v666_v14  ;;  %v658_v24 = vld [vmem:[%s2259_s2 + $0xe0] sm:$0xff]  ;;  %v657_v26 = vld [vmem:[%s2259_s2 + $0xd8] sm:$0xff]  ;;  %v655_v28 = vld [vmem:[%s2259_s2 + $0xc8] sm:$0xff] }
   0xa   :  { %917 = vmatpush1.msra.mxu1 %v762_v15  ;;  %847 = vmatprep.subr.mxu0 %v664_v16  ;;  %v754_v25 = vld [vmem:[%s2259_s2 + $0x3e0] sm:$0xff]  ;;  %v753_v27 = vld [vmem:[%s2259_s2 + $0x3d8] sm:$0xff]  ;;  %v751_v29 = vld [vmem:[%s2259_s2 + $0x3c8] sm:$0xff] }
   0xb   :  { %918 = vmatprep.subr.mxu1 %v760_v17  ;;  %848 = vmatpush1.msra.mxu0 %v663_v18  ;;  %v654_v30 = vld [vmem:[%s2259_s2 + $0xc0] sm:$0xff]  ;;  %v652_v32 = vld [vmem:[%s2259_s2 + $0xb0] sm:$0xff]  ;;  %v651_v34 = vld [vmem:[%s2259_s2 + $0xa8] sm:$0xff]  ;;  %v1242_v17 = vmov 1983009808  }
   0xc   :  { %919 = vmatpush1.msra.mxu1 %v759_v19  ;;  %849 = vmatprep.subr.mxu0 %v661_v20  ;;  %v750_v31 = vld [vmem:[%s2259_s2 + $0x3c0] sm:$0xff]  ;;  %v748_v33 = vld [vmem:[%s2259_s2 + $0x3b0] sm:$0xff]  ;;  %v747_v35 = vld [vmem:[%s2259_s2 + $0x3a8] sm:$0xff]  ;;  %v191_v18 = vunpack.c.l.s4 %v1242_v17 }
   0xd   :  { %920 = vmatprep.subr.mxu1 %v757_v21  ;;  %850 = vmatpush1.msra.mxu0 %v660_v22  ;;  %v649_v36 = vld [vmem:[%s2259_s2 + $0x98] sm:$0xff]  ;;  %v648_v38 = vld [vmem:[%s2259_s2 + $0x90] sm:$0xff]  ;;  %v646_v40 = vld [vmem:[%s2259_s2 + $0x80] sm:$0xff]  ;;  %v45_v21 = vshrl.u32 %v44_v10, 7 }
   0xe   :  { %921 = vmatpush1.msra.mxu1 %v756_v23  ;;  %851 = vmatprep.subr.mxu0 %v658_v24  ;;  %v745_v37 = vld [vmem:[%s2259_s2 + $0x398] sm:$0xff]  ;;  %v744_v39 = vld [vmem:[%s2259_s2 + $0x390] sm:$0xff]  ;;  %v742_v41 = vld [vmem:[%s2259_s2 + $0x380] sm:$0xff] }
   0xf   :  { %922 = vmatprep.subr.mxu1 %v754_v25  ;;  %852 = vmatpush1.msra.mxu0 %v657_v26  ;;  %v645_v42 = vld [vmem:[%s2259_s2 + $0x78] sm:$0xff]  ;;  %v643_v44 = vld [vmem:[%s2259_s2 + $0x68] sm:$0xff]  ;;  %v642_v46 = vld [vmem:[%s2259_s2 + $0x60] sm:$0xff] }
  0x10   :  { %923 = vmatpush1.msra.mxu1 %v753_v27  ;;  %853 = vmatprep.subr.mxu0 %v655_v28  ;;  %v741_v43 = vld [vmem:[%s2259_s2 + $0x378] sm:$0xff]  ;;  %v739_v45 = vld [vmem:[%s2259_s2 + $0x368] sm:$0xff]  ;;  %v738_v47 = vld [vmem:[%s2259_s2 + $0x360] sm:$0xff]  ;;  %v192_v28 = vunpack.c.0.s8 %v191_v18 }
  0x11   :  { %924 = vmatprep.subr.mxu1 %v751_v29  ;;  %854 = vmatpush1.msra.mxu0 %v654_v30  ;;  %v640_v48 = vld [vmem:[%s2259_s2 + $0x50] sm:$0xff]  ;;  %v639_v50 = vld [vmem:[%s2259_s2 + $0x48] sm:$0xff]  ;;  %v637_v52 = vld [vmem:[%s2259_s2 + $0x38] sm:$0xff] }
  0x12   :  { %925 = vmatpush1.msra.mxu1 %v750_v31  ;;  %855 = vmatprep.subr.mxu0 %v652_v32  ;;  %v736_v49 = vld [vmem:[%s2259_s2 + $0x350] sm:$0xff]  ;;  %v735_v51 = vld [vmem:[%s2259_s2 + $0x348] sm:$0xff]  ;;  %v733_v53 = vld [vmem:[%s2259_s2 + $0x338] sm:$0xff]  ;;  %v1540_v31 = vsub.s32 0, %v45_v21  ;;  %v1542_v32 = vsub.s32 1, %v45_v21 }
  0x13   :  { %926 = vmatprep.subr.mxu1 %v748_v33  ;;  %856 = vmatpush1.msra.mxu0 %v651_v34  ;;  %v636_v54 = vld [vmem:[%s2259_s2 + $0x30] sm:$0xff]  ;;  %v634_v56 = vld [vmem:[%s2259_s2 + $0x20] sm:$0xff]  ;;  %v633_v58 = vld [vmem:[%s2259_s2 + $0x18] sm:$0xff]  ;;  %v1544_v33 = vsub.s32 2, %v45_v21 }
  0x14   :  { %927 = vmatpush1.msra.mxu1 %v747_v35  ;;  %857 = vmatprep.subr.mxu0 %v649_v36  ;;  %v732_v55 = vld [vmem:[%s2259_s2 + $0x330] sm:$0xff]  ;;  %v730_v57 = vld [vmem:[%s2259_s2 + $0x320] sm:$0xff]  ;;  %v729_v59 = vld [vmem:[%s2259_s2 + $0x318] sm:$0xff]  ;;  %v1552_v36 = vsub.s32 3, %v45_v21 }
  0x15   :  { %928 = vmatprep.subr.mxu1 %v745_v37  ;;  %858 = vmatpush1.msra.mxu0 %v648_v38  ;;  %v631_v60 = vld [vmem:[%s2259_s2 + $0x8] sm:$0xff]  ;;  %v630_v62 = vld [vmem:[%s2259_s2] sm:$0xff]  ;;  %v724_v0 = vld [vmem:[%s2259_s2 + $0x2f0] sm:$0xff] }
  0x16   :  { %929 = vmatpush1.msra.mxu1 %v744_v39  ;;  %859 = vmatprep.subr.mxu0 %v646_v40  ;;  %v727_v61 = vld [vmem:[%s2259_s2 + $0x308] sm:$0xff]  ;;  %v726_v63 = vld [vmem:[%s2259_s2 + $0x300] sm:$0xff]  ;;  %v820_v1 = vld [vmem:[%s2259_s2 + $0x5f0] sm:$0xff] }
  0x17   :  { %930 = vmatprep.subr.mxu1 %v742_v41  ;;  %860 = vmatpush1.msra.mxu0 %v645_v42  ;;  %v723_v2 = vld [vmem:[%s2259_s2 + $0x2e8] sm:$0xff]  ;;  %v721_v4 = vld [vmem:[%s2259_s2 + $0x2d8] sm:$0xff]  ;;  %v720_v6 = vld [vmem:[%s2259_s2 + $0x2d0] sm:$0xff] }
  0x18   :  { %931 = vmatpush1.msra.mxu1 %v741_v43  ;;  %861 = vmatprep.subr.mxu0 %v643_v44  ;;  %v819_v3 = vld [vmem:[%s2259_s2 + $0x5e8] sm:$0xff]  ;;  %v817_v5 = vld [vmem:[%s2259_s2 + $0x5d8] sm:$0xff]  ;;  %v816_v7 = vld [vmem:[%s2259_s2 + $0x5d0] sm:$0xff]  ;;  %v1576_v43 = vsub.s32 %v192_v28, %v45_v21 }
  0x19   :  { %932 = vmatprep.subr.mxu1 %v739_v45  ;;  %862 = vmatpush1.msra.mxu0 %v642_v46  ;;  %v718_v8 = vld [vmem:[%s2259_s2 + $0x2c0] sm:$0xff]  ;;  %v717_v11 = vld [vmem:[%s2259_s2 + $0x2b8] sm:$0xff]  ;;  %v715_v13 = vld [vmem:[%s2259_s2 + $0x2a8] sm:$0xff] }
  0x1a   :  { %933 = vmatpush1.msra.mxu1 %v738_v47  ;;  %863 = vmatprep.subr.mxu0 %v640_v48  ;;  %v814_v9 = vld [vmem:[%s2259_s2 + $0x5c0] sm:$0xff]  ;;  %v813_v12 = vld [vmem:[%s2259_s2 + $0x5b8] sm:$0xff]  ;;  %v811_v14 = vld [vmem:[%s2259_s2 + $0x5a8] sm:$0xff] }
  0x1b   :  { %934 = vmatprep.subr.mxu1 %v736_v49  ;;  %864 = vmatpush1.msra.mxu0 %v639_v50  ;;  %v714_v15 = vld [vmem:[%s2259_s2 + $0x2a0] sm:$0xff]  ;;  %v712_v19 = vld [vmem:[%s2259_s2 + $0x290] sm:$0xff]  ;;  %v711_v22 = vld [vmem:[%s2259_s2 + $0x288] sm:$0xff] }
  0x1c   :  { %935 = vmatpush1.msra.mxu1 %v735_v51  ;;  %865 = vmatprep.subr.mxu0 %v637_v52  ;;  %v810_v16 = vld [vmem:[%s2259_s2 + $0x5a0] sm:$0xff]  ;;  %v808_v20 = vld [vmem:[%s2259_s2 + $0x590] sm:$0xff]  ;;  %v807_v23 = vld [vmem:[%s2259_s2 + $0x588] sm:$0xff] }
  0x1d   :  { %936 = vmatprep.subr.mxu1 %v733_v53  ;;  %866 = vmatpush1.msra.mxu0 %v636_v54  ;;  %v709_v24 = vld [vmem:[%s2259_s2 + $0x278] sm:$0xff]  ;;  %v708_v26 = vld [vmem:[%s2259_s2 + $0x270] sm:$0xff]  ;;  %v706_v29 = vld [vmem:[%s2259_s2 + $0x260] sm:$0xff] }
  0x1e   :  { %937 = vmatpush1.msra.mxu1 %v732_v55  ;;  %867 = vmatprep.subr.mxu0 %v634_v56  ;;  %v805_v25 = vld [vmem:[%s2259_s2 + $0x578] sm:$0xff]  ;;  %v804_v27 = vld [vmem:[%s2259_s2 + $0x570] sm:$0xff]  ;;  %v802_v30 = vld [vmem:[%s2259_s2 + $0x560] sm:$0xff] }
  0x1f   :  { %938 = vmatprep.subr.mxu1 %v730_v57  ;;  %868 = vmatpush1.msra.mxu0 %v633_v58  ;;  %v705_v34 = vld [vmem:[%s2259_s2 + $0x258] sm:$0xff]  ;;  %v703_v37 = vld [vmem:[%s2259_s2 + $0x248] sm:$0xff]  ;;  %v702_v39 = vld [vmem:[%s2259_s2 + $0x240] sm:$0xff] }
  0x20   :  { %939 = vmatpush1.msra.mxu1 %v729_v59  ;;  %869 = vmatprep.subr.mxu0 %v631_v60  ;;  %v801_v35 = vld [vmem:[%s2259_s2 + $0x558] sm:$0xff]  ;;  %v799_v38 = vld [vmem:[%s2259_s2 + $0x548] sm:$0xff]  ;;  %v798_v40 = vld [vmem:[%s2259_s2 + $0x540] sm:$0xff] }
  0x21   :  { %940 = vmatprep.subr.mxu1 %v727_v61  ;;  %870 = vmatpush1.msra.mxu0 %v630_v62  ;;  %v1569_v41 = vld [vmem:[%s2260_s1] sm:$0xf]  ;;  %v1574_v42 = vld [vmem:[%s2260_s1 + $0x4] sm:$0xf]  ;;  %v700_v44 = vld [vmem:[%s2259_s2 + $0x230] sm:$0xff] }
  0x22   :  { %941 = vmatpush1.msra.mxu1 %v726_v63  ;;  %871 = vmatprep.subr.mxu0 %v724_v0  ;;  %v796_v45 = vld [vmem:[%s2259_s2 + $0x530] sm:$0xff]  ;;  %v1587_v46 = vld [vmem:[%s2260_s1 + $0x8] sm:$0xf]  ;;  %v47_v47 = vrot.slane %v1569_v41, %v1540_v31  ;;  %v51_v48 = vrot.slane %v1569_v41, %v1542_v32  ;;  %v55_v49 = vrot.slane %v1569_v41, %v1544_v33  ;;  %v1604_v52 = vld [vmem:[%s2260_s1 + $0xc] sm:$0xf] }
  0x23   :  { %942 = vmatprep.subr.mxu1 %v820_v1  ;;  %872 = vmatpush2.msra.mxu0 %v723_v2  ;;  %v699_v50 = vld [vmem:[%s2259_s2 + $0x228] sm:$0xff]  ;;  %v59_v53 = vrot.slane %v1569_v41, %v1552_v36  ;;  %v63_v54 = vrot.slane %v1574_v42, %v1540_v31  ;;  %v67_v55 = vrot.slane %v1574_v42, %v1542_v32  ;;  %v697_v56 = vld [vmem:[%s2259_s2 + $0x218] sm:$0xff]  ;;  %v1621_v58 = vld [vmem:[%s2260_s1 + $0x10] sm:$0xf] }
  0x24   :  { %943 = vmatpush2.msra.mxu1 %v819_v3  ;;  %873 = vmatprep.subr.mxu0 %v721_v4  ;;  %v795_v51 = vld [vmem:[%s2259_s2 + $0x528] sm:$0xff]  ;;  %v793_v57 = vld [vmem:[%s2259_s2 + $0x518] sm:$0xff]  ;;  %v71_v59 = vrot.slane %v1574_v42, %v1544_v33  ;;  %v75_v60 = vrot.slane %v1574_v42, %v1552_v36  ;;  %v79_v61 = vrot.slane %v1587_v46, %v1540_v31  ;;  %v696_v62 = vld [vmem:[%s2259_s2 + $0x210] sm:$0xff] }
  0x25   :  { %944 = vmatprep.subr.mxu1 %v817_v5  ;;  %874 = vmatpush2.msra.mxu0 %v720_v6  ;;  %v792_v63 = vld [vmem:[%s2259_s2 + $0x510] sm:$0xff]  ;;  %v83_v1 = vrot.slane %v1587_v46, %v1542_v32  ;;  %v87_v2 = vrot.slane %v1587_v46, %v1544_v33  ;;  %v91_v3 = vrot.slane %v1587_v46, %v1552_v36  ;;  %v694_v4 = vld [vmem:[%s2259_s2 + $0x200] sm:$0xff]  ;;  %v787_v17 = vld [vmem:[%s2259_s2 + $0x4e8] sm:$0xff] }
  0x26   :  { %945 = vmatpush2.msra.mxu1 %v816_v7  ;;  %875 = vmatprep.subr.mxu0 %v718_v8  ;;  %v1638_v0 = vld [vmem:[%s2260_s1 + $0x14] sm:$0xf]  ;;  %v790_v5 = vld [vmem:[%s2259_s2 + $0x500] sm:$0xff]  ;;  %v95_v6 = vrot.slane %v1604_v52, %v1540_v31  ;;  %v99_v7 = vrot.slane %v1604_v52, %v1542_v32  ;;  %v103_v8 = vrot.slane %v1604_v52, %v1544_v33  ;;  %v1684_v18 = vld [vmem:[%s2260_s1 + $0x1c] sm:$0xf] }
  0x27   :  { %946 = vmatprep.subr.mxu1 %v814_v9  ;;  %876 = vmatpush2.msra.mxu0 %v717_v11  ;;  %v693_v9 = vld [vmem:[%s2259_s2 + $0x1f8] sm:$0xff]  ;;  %v127_v21 = vrot.slane %v1638_v0, %v1540_v31  ;;  %v688_v28 = vld [vmem:[%s2259_s2 + $0x1d0] sm:$0xff]  ;;  %v206_v41 = vcombine.low %v71_v59, %v75_v60  ;;  %v679_v42 = vld [vmem:[%s2259_s2 + $0x188] sm:$0xff] }
  0x28   :  { %947 = vmatpush2.msra.mxu1 %v813_v12  ;;  %877 = vmatprep.subr.mxu0 %v715_v13  ;;  %v789_v11 = vld [vmem:[%s2259_s2 + $0x4f8] sm:$0xff]  ;;  %v107_v13 = vrot.slane %v1604_v52, %v1552_v36  ;;  %v678_v46 = vld [vmem:[%s2259_s2 + $0x180] sm:$0xff] }
  0x29   :  { %948 = vmatprep.subr.mxu1 %v811_v14  ;;  %878 = vmatpush2.msra.mxu0 %v714_v15  ;;  %v1667_v12 = vld [vmem:[%s2260_s1 + $0x18] sm:$0xf]  ;;  %v111_v14 = vrot.slane %v1621_v58, %v1540_v31  ;;  %v115_v15 = vrot.slane %v1621_v58, %v1542_v32 }
  0x2a   :  { %949 = vmatpush2.msra.mxu1 %v810_v16  ;;  %879 = vmatprep.subr.mxu0 %v712_v19  ;;  %v691_v16 = vld [vmem:[%s2259_s2 + $0x1e8] sm:$0xff]  ;;  %v119_v19 = vrot.slane %v1621_v58, %v1544_v33 }
  0x2b   :  { %950 = vmatprep.subr.mxu1 %v808_v20  ;;  %880 = vmatpush2.msra.mxu0 %v711_v22  ;;  %v123_v20 = vrot.slane %v1621_v58, %v1552_v36  ;;  %v690_v22 = vld [vmem:[%s2259_s2 + $0x1e0] sm:$0xff] }
  0x2c   :  { %951 = vmatpush2.msra.mxu1 %v807_v23  ;;  %881 = vmatprep.subr.mxu0 %v709_v24  ;;  %v786_v23 = vld [vmem:[%s2259_s2 + $0x4e0] sm:$0xff] }
  0x2d   :  { %952 = vmatprep.subr.mxu1 %v805_v25  ;;  %882 = vmatpush2.msra.mxu0 %v708_v26  ;;  %v1701_v24 = vld [vmem:[%s2260_s1 + $0x20] sm:$0xf]  ;;  %v131_v25 = vrot.slane %v1638_v0, %v1542_v32  ;;  %v135_v26 = vrot.slane %v1638_v0, %v1544_v33 }
  0x2e   :  { %953 = vmatpush2.msra.mxu1 %v804_v27  ;;  %883 = vmatprep.subr.mxu0 %v706_v29  ;;  %v139_v27 = vrot.slane %v1638_v0, %v1552_v36  ;;  %v784_v29 = vld [vmem:[%s2259_s2 + $0x4d0] sm:$0xff] }
  0x2f   :  { %954 = vmatprep.subr.mxu1 %v802_v30  ;;  %884 = vmatpush2.msra.mxu0 %v705_v34  ;;  %v143_v30 = vrot.slane %v1667_v12, %v1540_v31  ;;  %v147_v34 = vrot.slane %v1667_v12, %v1542_v32 }
  0x30   :  { %955 = vmatpush2.msra.mxu1 %v801_v35  ;;  %885 = vmatprep.subr.mxu0 %v703_v37  ;;  %v151_v35 = vrot.slane %v1667_v12, %v1544_v33  ;;  %v687_v37 = vld [vmem:[%s2259_s2 + $0x1c8] sm:$0xff] }
  0x31   :  { %956 = vmatprep.subr.mxu1 %v799_v38  ;;  %886 = vmatpush2.msra.mxu0 %v702_v39  ;;  %v783_v38 = vld [vmem:[%s2259_s2 + $0x4c8] sm:$0xff]  ;;  %v155_v39 = vrot.slane %v1667_v12, %v1552_v36  ;;  %v290_v58 = vcombine.low %v143_v30, %v147_v34 }
  0x32   :  { %957 = vmatpush2.msra.mxu1 %v798_v40  ;;  %887 = vmatprep.subr.mxu0 %v700_v44  ;;  %v159_v40 = vrot.slane %v1684_v18, %v1540_v31  ;;  %v163_v44 = vrot.slane %v1684_v18, %v1542_v32  ;;  %v18_v12 = vld [vmem:[%s2261_s0 + $0x8] sm:$0xff] }
  0x33   :  { %958 = vmatprep.subr.mxu1 %v796_v45  ;;  %888 = vmatpush2.msra.mxu0 %v699_v50  ;;  %v685_v45 = vld [vmem:[%s2259_s2 + $0x1b8] sm:$0xff]  ;;  %v298_v30 = vrot.slane %v290_v58, %v1576_v43 }
  0x34   :  { %959 = vmatpush2.msra.mxu1 %v795_v51  ;;  %889 = vmatprep.subr.mxu0 %v697_v56  ;;  %v781_v50 = vld [vmem:[%s2259_s2 + $0x4b8] sm:$0xff]  ;;  %v167_v51 = vrot.slane %v1684_v18, %v1544_v33  ;;  %v171_v56 = vrot.slane %v1684_v18, %v1552_v36 }
  0x35   :  { %960 = vmatprep.subr.mxu1 %v793_v57  ;;  %890 = vmatpush2.msra.mxu0 %v696_v62  ;;  %v175_v57 = vrot.slane %v1701_v24, %v1540_v31  ;;  %v684_v62 = vld [vmem:[%s2259_s2 + $0x1b0] sm:$0xff] }
  0x36   :  { %961 = vmatpush2.msra.mxu1 %v792_v63  ;;  %891 = vmatprep.subr.mxu0 %v694_v4  ;;  %v780_v63 = vld [vmem:[%s2259_s2 + $0x4b0] sm:$0xff]  ;;  %v179_v4 = vrot.slane %v1701_v24, %v1542_v32 }
  0x37   :  { %962 = vmatprep.subr.mxu1 %v790_v5  ;;  %892 = vmatpush2.msra.mxu0 %v693_v9  ;;  %v183_v5 = vrot.slane %v1701_v24, %v1544_v33  ;;  %v187_v9 = vrot.slane %v1701_v24, %v1552_v36 }
  0x38   :  { %963 = vmatpush2.msra.mxu1 %v789_v11  ;;  %893 = vmatprep.subr.mxu0 %v691_v16  ;;  %v682_v11 = vld [vmem:[%s2259_s2 + $0x1a0] sm:$0xff]  ;;  %v324_v18 = vcombine.low %v175_v57, %v179_v4  ;;  %v23_v57 = vld [vmem:[%s2261_s0 + $0x30] sm:$0xff] }
  0x39   :  { %964 = vmatprep.subr.mxu1 %v787_v17  ;;  %894 = vmatpush2.msra.mxu0 %v690_v22  ;;  %v778_v16 = vld [vmem:[%s2259_s2 + $0x4a0] sm:$0xff]  ;;  %v188_v17 = vcombine.low %v47_v47, %v51_v48  ;;  %v189_v22 = vcombine.low %v55_v49, %v59_v53  ;;  %v681_v47 = vld [vmem:[%s2259_s2 + $0x198] sm:$0xff]  ;;  %v222_v49 = vcombine.low %v79_v61, %v83_v1 }
  0x3a   :  { %965 = vmatpush2.msra.mxu1 %v786_v23  ;;  %895 = vmatprep.subr.mxu0 %v688_v28  ;;  %v205_v23 = vcombine.low %v63_v54, %v67_v55  ;;  %v777_v48 = vld [vmem:[%s2259_s2 + $0x498] sm:$0xff]  ;;  %v223_v53 = vcombine.low %v87_v2, %v91_v3  ;;  %v775_v54 = vld [vmem:[%s2259_s2 + $0x488] sm:$0xff]  ;;  %v220_v61 = vrot.slane %v206_v41, %v1576_v43 }
  0x3b   :  { %966 = vmatprep.subr.mxu1 %v784_v29  ;;  %896 = vmatpush2.msra.mxu0 %v687_v37  ;;  %v196_v55 = vrot.slane %v188_v17, %v1576_v43  ;;  %v203_v59 = vrot.slane %v189_v22, %v1576_v43  ;;  %v230_v1 = vrot.slane %v222_v49, %v1576_v43  ;;  %v774_v37 = vld [vmem:[%s2259_s2 + $0x480] sm:$0xff] }
  0x3c   :  { %967 = vmatpush2.msra.mxu1 %v783_v38  ;;  %897 = vmatprep.subr.mxu0 %v685_v45  ;;  %v213_v60 = vrot.slane %v205_v23, %v1576_v43  ;;  %v237_v2 = vrot.slane %v223_v53, %v1576_v43  ;;  %v239_v28 = vcombine.low %v95_v6, %v99_v7 }
  0x3d   :  { %968 = vmatprep.subr.mxu1 %v781_v50  ;;  %898 = vmatpush2.msra.mxu0 %v684_v62  ;;  %v204_v3 = vcombine.low %v196_v55, %v203_v59  ;;  %v240_v29 = vcombine.low %v103_v8, %v107_v13  ;;  %v256_v6 = vcombine.low %v111_v14, %v115_v15 }
  0x3e   :  { %969 = vmatpush2.msra.mxu1 %v780_v63  ;;  %899 = vmatprep.subr.mxu0 %v682_v11  ;;  %v221_v38 = vcombine.low %v213_v60, %v220_v61  ;;  %v238_v45 = vcombine.low %v230_v1, %v237_v2  ;;  %v247_v7 = vrot.slane %v239_v28, %v1576_v43 }
  0x3f   :  { %970 = vmatprep.subr.mxu1 %v778_v16  ;;  %900 = vmatpush2.msra.mxu0 %v681_v47  ;;  %v254_v52 = vrot.slane %v240_v29, %v1576_v43  ;;  %v257_v8 = vcombine.low %v119_v19, %v123_v20  ;;  %v273_v13 = vcombine.low %v127_v21, %v131_v25 }
  0x40   :  { %971 = vmatpush2.msra.mxu1 %v777_v48  ;;  %901 = vmatprep.subr.mxu0 %v679_v42  ;;  %v264_v14 = vrot.slane %v256_v6, %v1576_v43  ;;  %v274_v15 = vcombine.low %v135_v26, %v139_v27  ;;  %v291_v19 = vcombine.low %v151_v35, %v155_v39  ;;  %v17_v26 = vld [vmem:[%s2261_s0] sm:$0xff]  ;;  %v19_v39 = vld [vmem:[%s2261_s0 + $0x10] sm:$0xff] }
  0x41   :  { %972 = vmatprep.subr.mxu1 %v775_v54  ;;  %902 = vmatpush2.msra.mxu0 %v678_v46  ;;  %v255_v20 = vcombine.low %v247_v7, %v254_v52  ;;  %v271_v21 = vrot.slane %v257_v8, %v1576_v43  ;;  %v281_v0 = vrot.slane %v273_v13, %v1576_v43  ;;  %v25_v48 = vld [vmem:[%s2261_s0 + $0x40] sm:$0xff] }
  0x42   :  { %973 = vmatpush2.msra.mxu1 %v774_v37  ;;  %v307_v25 = vcombine.low %v159_v40, %v163_v44  ;;  %v288_v27 = vrot.slane %v274_v15, %v1576_v43  ;;  %v305_v34 = vrot.slane %v291_v19, %v1576_v43  ;;  %v308_v35 = vcombine.low %v167_v51, %v171_v56  ;;  %v20_v40 = vld [vmem:[%s2261_s0 + $0x18] sm:$0xff]  ;;  %v21_v44 = vld [vmem:[%s2261_s0 + $0x20] sm:$0xff]  ;;  %v22_v56 = vld [vmem:[%s2261_s0 + $0x28] sm:$0xff] }
  0x43   :  { %v272_v50 = vcombine.low %v264_v14, %v271_v21  ;;  %v325_v51 = vcombine.low %v183_v5, %v187_v9  ;;  %v332_v4 = vrot.slane %v324_v18, %v1576_v43  ;;  %v350_v17 = vmul.f32 %v204_v3, %v17_v26  ;;  %v24_v5 = vld [vmem:[%s2261_s0 + $0x38] sm:$0xff] }
  0x44   :  { %v315_v62 = vrot.slane %v307_v25, %v1576_v43  ;;  %v289_v63 = vcombine.low %v281_v0, %v288_v27  ;;  %v306_v11 = vcombine.low %v298_v30, %v305_v34  ;;  %v322_v16 = vrot.slane %v308_v35, %v1576_v43 }
  0x45   :  { %v339_v36 = vrot.slane %v325_v51, %v1576_v43  ;;  %v351_v24 = vmul.f32 %v221_v38, %v18_v12  ;;  %v352_v22 = vmul.f32 %v238_v45, %v19_v39  ;;  %v353_v23 = vmul.f32 %v255_v20, %v20_v40 }
  0x46   :  { %v323_v9 = vcombine.low %v315_v62, %v322_v16  ;;  %v354_v47 = vmul.f32 %v272_v50, %v21_v44  ;;  %v355_v49 = vmul.f32 %v289_v63, %v22_v56  ;;  %v1935_v53 = vrot.slane %v350_v17, %v1576_v43 }
  0x47   :  { %v340_v41 = vcombine.low %v332_v4, %v339_v36  ;;  %v1938_v42 = vrot.slane %v351_v24, %v1576_v43  ;;  %v356_v54 = vmul.f32 %v306_v11, %v23_v57  ;;  %v1941_v55 = vrot.slane %v352_v22, %v1576_v43 }
  0x48   :  { %v1944_v59 = vrot.slane %v353_v23, %v1576_v43  ;;  %v1947_v60 = vrot.slane %v354_v47, %v1576_v43  ;;  %v357_v46 = vmul.f32 %v323_v9, %v24_v5  ;;  %v383_v61 = vcombine.high %v1935_v53, %v1935_v53 }
  0x49   :  { %v400_v1 = vcombine.high %v1938_v42, %v1938_v42  ;;  %v1954_v2 = vrot.slane %v355_v49, %v1576_v43  ;;  %v358_v3 = vmul.f32 %v340_v41, %v25_v48  ;;  %v417_v28 = vcombine.high %v1941_v55, %v1941_v55 }
  0x4a   :  { %v434_v29 = vcombine.high %v1944_v59, %v1944_v59  ;;  %v1961_v37 = vrot.slane %v356_v54, %v1576_v43  ;;  %v451_v38 = vcombine.high %v1947_v60, %v1947_v60  ;;  %v1968_v6 = vrot.slane %v357_v46, %v1576_v43 }
  0x4b   :  { %v468_v45 = vcombine.high %v1954_v2, %v1954_v2  ;;  %v575_v7 = vsel %vm557_vm0, %v383_v61, 0.0  ;;  %v576_v52 = vsel %vm557_vm0, %v400_v1, 0.0  ;;  %v578_v8 = vsel %vm557_vm0, %v417_v28, 0.0 }
  0x4c   :  { %v485_v13 = vcombine.high %v1961_v37, %v1961_v37  ;;  %v1976_v14 = vrot.slane %v358_v3, %v1576_v43  ;;  %v577_v15 = vadd.f32 %v576_v52, %v575_v7  ;;  %v502_v58 = vcombine.high %v1968_v6, %v1968_v6 }
  0x4d   :  { %v580_v19 = vsel %vm557_vm0, %v434_v29, 0.0  ;;  %v368_v20 = vcombine.high %v350_v17, %v350_v17  ;;  %v385_v21 = vcombine.high %v351_v24, %v351_v24  ;;  %v582_v25 = vsel %vm557_vm0, %v451_v38, 0.0 }
  0x4e   :  { %v579_v0 = vadd.f32 %v578_v8, %v577_v15  ;;  %v584_v26 = vsel %vm557_vm0, %v468_v45, 0.0  ;;  %v402_v12 = vcombine.high %v352_v22, %v352_v22  ;;  %v419_v34 = vcombine.high %v353_v23, %v353_v23 }
  0x4f   :  { %v382_v27 = vrot.slane %v368_v20, %v1576_v43  ;;  %v399_v30 = vrot.slane %v385_v21, %v1576_v43  ;;  %v436_v35 = vcombine.high %v354_v47, %v354_v47  ;;  %v453_v44 = vcombine.high %v355_v49, %v355_v49 }
  0x50   :  { %v581_v39 = vadd.f32 %v580_v19, %v579_v0  ;;  %v416_v40 = vrot.slane %v402_v12, %v1576_v43  ;;  %v470_v50 = vcombine.high %v356_v54, %v356_v54  ;;  %v433_v51 = vrot.slane %v419_v34, %v1576_v43 }
  0x51   :  { %v384_v62 = vcombine.high %v382_v27, %v382_v27  ;;  %v401_v18 = vcombine.high %v399_v30, %v399_v30  ;;  %v450_v56 = vrot.slane %v436_v35, %v1576_v43  ;;  %v519_v63 = vcombine.high %v1976_v14, %v1976_v14 }
  0x52   :  { %v583_v11 = vadd.f32 %v582_v25, %v581_v39  ;;  %v586_v16 = vsel %vm557_vm0, %v485_v13, 0.0  ;;  %v418_v57 = vcombine.high %v416_v40, %v416_v40  ;;  %v435_v4 = vcombine.high %v433_v51, %v433_v51 }
  0x53   :  { %v467_v36 = vrot.slane %v453_v44, %v1576_v43  ;;  %v487_v17 = vcombine.high %v357_v46, %v357_v46  ;;  %v504_v24 = vcombine.high %v358_v3, %v358_v3  ;;  %v588_v9 = vsel %vm557_vm0, %v502_v58, 0.0 }
  0x54   :  { %v585_v5 = vadd.f32 %v584_v26, %v583_v11  ;;  %v609_v22 = vsel %vm557_vm0, %v384_v62, 0.0  ;;  %v452_v23 = vcombine.high %v450_v56, %v450_v56  ;;  %v484_v47 = vrot.slane %v470_v50, %v1576_v43 }
  0x55   :  { %v610_v48 = vsel %vm557_vm0, %v401_v18, 0.0  ;;  %v612_v41 = vsel %vm557_vm0, %v418_v57, 0.0  ;;  %v590_v54 = vsel %vm557_vm0, %v519_v63, 0.0  ;;  %v469_v1 = vcombine.high %v467_v36, %v467_v36 }
  0x56   :  { %v587_v49 = vadd.f32 %v586_v16, %v585_v5  ;;  %v611_v61 = vadd.f32 %v610_v48, %v609_v22  ;;  %v501_v46 = vrot.slane %v487_v17, %v1576_v43  ;;  %v518_v3 = vrot.slane %v504_v24, %v1576_v43 }
  0x57   :  { %v614_v28 = vsel %vm557_vm0, %v435_v4, 0.0  ;;  %v558_v45 = vsel %vm557_vm0, %v1935_v53, 0.0  ;;  %v559_v7 = vsel %vm557_vm0, %v1938_v42, 0.0  ;;  %v486_v52 = vcombine.high %v484_v47, %v484_v47 }
  0x58   :  { %v589_v29 = vadd.f32 %v588_v9, %v587_v49  ;;  %v613_v38 = vadd.f32 %v612_v41, %v611_v61  ;;  %v616_v8 = vsel %vm557_vm0, %v452_v23, 0.0  ;;  %v560_v13 = vadd.f32 %v559_v7, %v558_v45  ;;  %v725_v61 = vld [vmem:[%s2259_s2 + $0x2f8] sm:$0xff]  ;;  %v818_v45 = vld [vmem:[%s2259_s2 + $0x5e0] sm:$0xff]  ;;  %v671_v7 = vld [vmem:[%s2259_s2 + $0x148] sm:$0xff] }
  0x59   :  { %v561_v15 = vsel %vm557_vm0, %v1941_v55, 0.0  ;;  %v563_v43 = vsel %vm557_vm0, %v1944_v59, 0.0  ;;  %v503_v20 = vcombine.high %v501_v46, %v501_v46  ;;  %v520_v21 = vcombine.high %v518_v3, %v518_v3  ;;  %1167 = vmatprep.subr.mxu0 %v725_v61  ;;  %v734_v61 = vld [vmem:[%s2259_s2 + $0x340] sm:$0xff] }
  0x5a   :  { %v591_v58 = vadd.f32 %v590_v54, %v589_v29  ;;  %v615_v19 = vadd.f32 %v614_v28, %v613_v38  ;;  %v618_v0 = vsel %vm557_vm0, %v469_v1, 0.0  ;;  %v562_v53 = vadd.f32 %v561_v15, %v560_v13  ;;  %v677_v1 = vld [vmem:[%s2259_s2 + $0x178] sm:$0xff]  ;;  %v674_v28 = vld [vmem:[%s2259_s2 + $0x160] sm:$0xff]  ;;  %v719_v38 = vld [vmem:[%s2259_s2 + $0x2c8] sm:$0xff] }
  0x5b   :  { %v565_v42 = vsel %vm557_vm0, %v1947_v60, 0.0  ;;  %v592_v12 = vsel %vm557_vm0, %v382_v27, 0.0  ;;  %v620_v34 = vsel %vm557_vm0, %v486_v52, 0.0  ;;  %v593_v35 = vsel %vm557_vm0, %v399_v30, 0.0  ;;  %v773_v29 = vld [vmem:[%s2259_s2 + $0x478] sm:$0xff]  ;;  %v770_v52 = vld [vmem:[%s2259_s2 + $0x460] sm:$0xff] }
  0x5c   :  { %v627_v25 = vmax.f32 %v591_v58, 0.0  ;;  %v617_v26 = vadd.f32 %v616_v8, %v615_v19  ;;  %v564_v55 = vadd.f32 %v563_v43, %v562_v53  ;;  %v595_v39 = vsel %vm557_vm0, %v416_v40, 0.0  ;;  %v815_v8 = vld [vmem:[%s2259_s2 + $0x5c8] sm:$0xff]  ;;  %v716_v13 = vld [vmem:[%s2259_s2 + $0x2b0] sm:$0xff]  ;;  %v713_v43 = vld [vmem:[%s2259_s2 + $0x298] sm:$0xff] }
  0x5d   :  { %v567_v44 = vsel %vm557_vm0, %v1954_v2, 0.0  ;;  %v594_v50 = vadd.f32 %v593_v35, %v592_v12  ;;  %v622_v62 = vsel %vm557_vm0, %v503_v20, 0.0  ;;  %v597_v60 = vsel %vm557_vm0, %v433_v51, 0.0  ;;  %v767_v15 = vld [vmem:[%s2259_s2 + $0x448] sm:$0xff]  ;;  %v668_v58 = vld [vmem:[%s2259_s2 + $0x130] sm:$0xff]  ;;  %v710_v53 = vld [vmem:[%s2259_s2 + $0x280] sm:$0xff] }
  0x5e   :  { %903 = vmatprep.mubr.f32.mxu0 %v627_v25  ;;  %v619_v59 = vadd.f32 %v618_v0, %v617_v26  ;;  %v566_v18 = vadd.f32 %v565_v42, %v564_v55  ;;  %v569_v27 = vsel %vm557_vm0, %v1961_v37, 0.0  ;;  %v624_v30 = vsel %vm557_vm0, %v520_v21, 0.0  ;;  %v812_v19 = vld [vmem:[%s2259_s2 + $0x5b0] sm:$0xff]  ;;  %v665_v21 = vld [vmem:[%s2259_s2 + $0x118] sm:$0xff]  ;;  %v662_v26 = vld [vmem:[%s2259_s2 + $0x100] sm:$0xff] }
  0x5f   :  { %v596_v11 = vadd.f32 %v595_v39, %v594_v50  ;;  %v599_v40 = vsel %vm557_vm0, %v450_v56, 0.0  ;;  %v571_v2 = vsel %vm557_vm0, %v1968_v6, 0.0  ;;  %v601_v24 = vsel %vm557_vm0, %v467_v36, 0.0  ;;  %v764_v20 = vld [vmem:[%s2259_s2 + $0x430] sm:$0xff]  ;;  %v809_v0 = vld [vmem:[%s2259_s2 + $0x598] sm:$0xff]  ;;  %v806_v42 = vld [vmem:[%s2259_s2 + $0x580] sm:$0xff] }
  0x60   :  { %v621_v63 = vadd.f32 %v620_v34, %v619_v59  ;;  %v568_v16 = vadd.f32 %v567_v44, %v566_v18  ;;  %v573_v51 = vsel %vm557_vm0, %v1976_v14, 0.0  ;;  %v603_v22 = vsel %vm557_vm0, %v484_v47, 0.0  ;;  %v707_v12 = vld [vmem:[%s2259_s2 + $0x268] sm:$0xff]  ;;  %v758_v34 = vld [vmem:[%s2259_s2 + $0x400] sm:$0xff]  ;;  %v704_v39 = vld [vmem:[%s2259_s2 + $0x250] sm:$0xff] }
  0x61   :  { %v598_v4 = vadd.f32 %v597_v60, %v596_v11  ;;  %v605_v56 = vsel %vm557_vm0, %v501_v46, 0.0  ;;  %v607_v36 = vsel %vm557_vm0, %v518_v3, 0.0  ;;  %v722_v46 = vld [vmem:[%s2259_s2 + $0x2e0] sm:$0xff]  ;;  %v821_v3 = vld [vmem:[%s2259_s2 + $0x5f8] sm:$0xff]  ;;  %v659_v55 = vld [vmem:[%s2259_s2 + $0xe8] sm:$0xff] }
  0x62   :  { %v623_v57 = vadd.f32 %v622_v62, %v621_v63  ;;  %v570_v17 = vadd.f32 %v569_v27, %v568_v16  ;;  %1202 = vmatprep.subr.mxu1 %v821_v3  ;;  %v803_v35 = vld [vmem:[%s2259_s2 + $0x568] sm:$0xff]  ;;  %v656_v44 = vld [vmem:[%s2259_s2 + $0xd0] sm:$0xff]  ;;  %v701_v62 = vld [vmem:[%s2259_s2 + $0x238] sm:$0xff] }
  0x63   :  { %v600_v9 = vadd.f32 %v599_v40, %v598_v4  ;;  %v755_v59 = vld [vmem:[%s2259_s2 + $0x3e8] sm:$0xff]  ;;  %v800_v50 = vld [vmem:[%s2259_s2 + $0x550] sm:$0xff]  ;;  %v653_v60 = vld [vmem:[%s2259_s2 + $0xb8] sm:$0xff] }
  0x64   :  { %v625_v5 = vadd.f32 %v624_v30, %v623_v57  ;;  %v572_v37 = vadd.f32 %v571_v2, %v570_v17  ;;  %v752_v18 = vld [vmem:[%s2259_s2 + $0x3d0] sm:$0xff]  ;;  %v797_v63 = vld [vmem:[%s2259_s2 + $0x538] sm:$0xff]  ;;  %v698_v27 = vld [vmem:[%s2259_s2 + $0x220] sm:$0xff] }
  0x65   :  { %v602_v48 = vadd.f32 %v601_v24, %v600_v9  ;;  %v749_v11 = vld [vmem:[%s2259_s2 + $0x3b8] sm:$0xff]  ;;  %v650_v30 = vld [vmem:[%s2259_s2 + $0xa0] sm:$0xff]  ;;  %v695_v40 = vld [vmem:[%s2259_s2 + $0x208] sm:$0xff] }
  0x66   :  { %v629_v23 = vmax.f32 %v625_v5, 0.0  ;;  %v2031_v41 = vadd.f32 %v573_v51, %v572_v37  ;;  %v794_v16 = vld [vmem:[%s2259_s2 + $0x520] sm:$0xff]  ;;  %v647_v2 = vld [vmem:[%s2259_s2 + $0x88] sm:$0xff]  ;;  %v692_v17 = vld [vmem:[%s2259_s2 + $0x1f0] sm:$0xff] }
  0x67   :  { %v604_v6 = vadd.f32 %v603_v22, %v602_v48  ;;  %v746_v57 = vld [vmem:[%s2259_s2 + $0x3a0] sm:$0xff]  ;;  %v791_v4 = vld [vmem:[%s2259_s2 + $0x508] sm:$0xff]  ;;  %v644_v5 = vld [vmem:[%s2259_s2 + $0x70] sm:$0xff] }
  0x68   :  { %974 = vmatprep.mubr.f32.mxu1 %v629_v23  ;;  %v626_v49 = vmax.f32 %v2031_v41, 0.0  ;;  %v743_v24 = vld [vmem:[%s2259_s2 + $0x388] sm:$0xff]  ;;  %v788_v51 = vld [vmem:[%s2259_s2 + $0x4f0] sm:$0xff]  ;;  %v689_v9 = vld [vmem:[%s2259_s2 + $0x1d8] sm:$0xff] }
  0x69   :  { %v606_v54 = vadd.f32 %v605_v56, %v604_v6  ;;  %v740_v37 = vld [vmem:[%s2259_s2 + $0x370] sm:$0xff]  ;;  %v641_v22 = vld [vmem:[%s2259_s2 + $0x58] sm:$0xff]  ;;  %v686_v48 = vld [vmem:[%s2259_s2 + $0x1c0] sm:$0xff] }
  0x6a   :  { %904 = vmatmul.mubr.f32.vlgmr.msra.gmra.mxu0 %v626_v49  ;;  %v737_v56 = vld [vmem:[%s2259_s2 + $0x358] sm:$0xff]  ;;  %v638_v6 = vld [vmem:[%s2259_s2 + $0x40] sm:$0xff]  ;;  %v680_v3 = vld [vmem:[%s2259_s2 + $0x190] sm:$0xff] }
  0x6b   :  { %v2038_v14 = vadd.f32 %v607_v36, %v606_v54  ;;  %1045 = vmatprep.mubr.f32.mxu0 %v627_v25  ;;  %1168 = vmatpush3.msra.mxu0 %v677_v1  ;;  %v761_v25 = vld [vmem:[%s2259_s2 + $0x418] sm:$0xff]  ;;  %v782_v36 = vld [vmem:[%s2259_s2 + $0x4c0] sm:$0xff]  ;;  %v683_v54 = vld [vmem:[%s2259_s2 + $0x1a8] sm:$0xff] }
  0x6c   :  { %1169 = vmatprep.subr.mxu0 %v722_v46  ;;  %v635_v1 = vld [vmem:[%s2259_s2 + $0x28] sm:$0xff]  ;;  %v1165_v41 = vld [vmem:[%s2262_s3 + $0x1] ss:$2 sm:$0x3] }
  0x6d   :  { %v628_v47 = vmax.f32 %v2038_v14, 0.0  ;;  %1170 = vmatpush3.msra.mxu0 %v674_v28  ;;  %v779_v46 = vld [vmem:[%s2259_s2 + $0x4a8] sm:$0xff]  ;;  %v1130_v14 = vrot.slane %v1165_v41, %v1540_v31 }
  0x6e   :  { %1171 = vmatprep.subr.mxu0 %v719_v38  ;;  %v731_v28 = vld [vmem:[%s2259_s2 + $0x328] sm:$0xff]  ;;  %v776_v38 = vld [vmem:[%s2259_s2 + $0x490] sm:$0xff] }
  0x6f   :  { %975 = vmatmul.mubr.f32.vlgmr.msra.gmra.mxu1 %v628_v47  ;;  %1172 = vmatpush3.msra.mxu0 %v671_v7  ;;  %v822_v7 = vld [vmem:[%s2262_s3] ss:$2 sm:$0x7] }
  0x70   :  { %1115 = vmatprep.mubr.f32.mxu1 %v629_v23  ;;  %1203 = vmatpush3.msra.mxu1 %v773_v29  ;;  %v785_v23 = vld [vmem:[%s2259_s2 + $0x4d8] sm:$0xff]  ;;  %v632_v29 = vld [vmem:[%s2259_s2 + $0x10] sm:$0xff] }
  0x71   :  { %1204 = vmatprep.subr.mxu1 %v818_v45  ;;  %1173 = vmatprep.subr.mxu0 %v716_v13  ;;  %v728_v45 = vld [vmem:[%s2259_s2 + $0x310] sm:$0xff]  ;;  %v831_v13 = vrot.slane %v822_v7, %v1542_v32 }
  0x72   :  { %1205 = vmatpush3.msra.mxu1 %v770_v52  ;;  %1174 = vmatpush3.msra.mxu0 %v668_v58  ;;  %v827_v52 = vrot.slane %v822_v7, %v1540_v31  ;;  %v1166_v31 = vld [vmem:[%s2262_s3 + $0x5] ss:$0 sm:$0xff] }
  0x73   :  { %1206 = vmatprep.subr.mxu1 %v815_v8  ;;  %1175 = vmatprep.subr.mxu0 %v713_v43 }
  0x74   :  { %1207 = vmatpush3.msra.mxu1 %v767_v15  ;;  %1176 = vmatpush3.msra.mxu0 %v665_v21 }
  0x75   :  { %1208 = vmatprep.subr.mxu1 %v812_v19  ;;  %1177 = vmatprep.subr.mxu0 %v710_v53 }
  0x76   :  { %1209 = vmatpush3.msra.mxu1 %v764_v20  ;;  %1178 = vmatpush3.msra.mxu0 %v662_v26 }
  0x77   :  { %1210 = vmatprep.subr.mxu1 %v809_v0  ;;  %1179 = vmatprep.subr.mxu0 %v707_v12  ;;  %v1134_v0 = vrot.slane %v1165_v41, %v1542_v32 }
  0x78   :  { %1211 = vmatpush3.msra.mxu1 %v761_v25  ;;  %1180 = vmatpush3.msra.mxu0 %v659_v55  ;;  %v1243_v55 = vmov 0  }
  0x79   :  { %1212 = vmatprep.subr.mxu1 %v806_v42  ;;  %1181 = vmatprep.subr.mxu0 %v704_v39 }
  0x7a   :  { %1213 = vmatpush3.msra.mxu1 %v758_v34  ;;  %1182 = vmatpush3.msra.mxu0 %v656_v44 }
  0x7b   :  { %1214 = vmatprep.subr.mxu1 %v803_v35  ;;  %1183 = vmatprep.subr.mxu0 %v701_v62  ;;  %v835_v62 = vrot.slane %v822_v7, %v1544_v33 }
  0x7c   :  { %1215 = vmatpush3.msra.mxu1 %v755_v59  ;;  %1184 = vmatpush3.msra.mxu0 %v653_v60 }
  0x7d   :  { %1216 = vmatprep.subr.mxu1 %v800_v50  ;;  %1185 = vmatprep.subr.mxu0 %v698_v27 }
  0x7e   :  { %1217 = vmatpush3.msra.mxu1 %v752_v18  ;;  %1186 = vmatpush3.msra.mxu0 %v650_v30 }
  0x7f   :  { %1218 = vmatprep.subr.mxu1 %v797_v63  ;;  %1187 = vmatprep.subr.mxu0 %v695_v40  ;;  %v1151_v63 = vand.u32 127, %v44_v10 }
  0x80   :  { %1219 = vmatpush3.msra.mxu1 %v749_v11  ;;  %1188 = vmatpush3.msra.mxu0 %v647_v2 }
  0x81   :  { %1220 = vmatprep.subr.mxu1 %v794_v16  ;;  %1189 = vmatprep.subr.mxu0 %v692_v17  ;;  %vm1152_vm1 = vcmp.eq.s32.totalorder %v1151_v63, 16 }
  0x82   :  { %1221 = vmatpush3.msra.mxu1 %v746_v57  ;;  %1190 = vmatpush3.msra.mxu0 %v644_v5 }
  0x83   :  { %1222 = vmatprep.subr.mxu1 %v791_v4  ;;  %1191 = vmatprep.subr.mxu0 %v689_v9 }
  0x84   :  { %1223 = vmatpush3.msra.mxu1 %v743_v24  ;;  %1192 = vmatpush3.msra.mxu0 %v641_v22 }
  0x85   :  { %1224 = vmatprep.subr.mxu1 %v788_v51  ;;  %1193 = vmatprep.subr.mxu0 %v686_v48 }
  0x86   :  { %1225 = vmatpush3.msra.mxu1 %v740_v37  ;;  %1194 = vmatpush3.msra.mxu0 %v638_v6 }
  0x87   :  { %1226 = vmatprep.subr.mxu1 %v785_v23  ;;  %1195 = vmatprep.subr.mxu0 %v683_v54 }
  0x88   :  { %1227 = vmatpush3.msra.mxu1 %v737_v56  ;;  %1196 = vmatpush3.msra.mxu0 %v635_v1 }
  0x89   :  { %1228 = vmatprep.subr.mxu1 %v782_v36  ;;  %1197 = vmatprep.subr.mxu0 %v680_v3 }
  0x8a   :  { %1229 = vmatpush3.msra.mxu1 %v734_v61  ;;  %1198 = vmatpush3.msra.mxu0 %v632_v29 }
  0x8b   :  { %1230 = vmatprep.subr.mxu1 %v779_v46  ;;  %1046 = vmatmul.mubr.f32.vlgmr.msra.gmra.mxu0 %v626_v49 }
  0x8c   :  { %1231 = vmatpush3.msra.mxu1 %v731_v28  ;;  %1239 = vset.pattern.permute.xlu0 %v1243_v55 }
  0x8d   :  { %1232 = vmatprep.subr.mxu1 %v776_v38 }
  0x8e   :  { %1233 = vmatpush3.msra.mxu1 %v728_v45 }
  0x8f   :  { %1116 = vmatmul.mubr.f32.vlgmr.msra.gmra.mxu1 %v628_v47 }
 0x12a   :  { %v905_v8 = vpop.f32.mrf.mxu0 }
 0x12b   :  { %v906_v15 = vadd.f32 %v905_v8, %v827_v52 }
 0x12c   :  { %v907_v58 = vpop.f32.mrf.mxu0 }
 0x12d   :  { %v908_v49 = vadd.f32 %v907_v58, %v831_v13 }
 0x12f   :  { %v976_v19 = vpop.f32.mrf.mxu1 }
 0x130   :  { %v977_v43 = vadd.f32 %v976_v19, %v906_v15 }
 0x131   :  { %v978_v47 = vpop.f32.mrf.mxu1 }
 0x132   :  { %v1121_v20 = vmax.f32 %v977_v43, 0.0  ;;  %v979_v21 = vadd.f32 %v978_v47, %v908_v49 }
 0x134   :  { %v1122_v53 = vmax.f32 %v979_v21, 0.0  ;;  %v1137_v25 = vmul.f32 %v1130_v14, %v1121_v20 }
 0x136   :  { %v1138_v26 = vmul.f32 %v1134_v0, %v1122_v53  ;;  %v1139_v42 = vsel %vm557_vm0, %v1137_v25, 0.0 }
 0x138   :  { %v1140_v12 = vsel %vm557_vm0, %v1138_v26, 0.0 }
 0x139   :  { %v1141_v34 = vadd.f32 %v1140_v12, %v1139_v42 }
 0x13b   :  { %1142 = vadd.xlane.f32.xlu0 %v1141_v34 }
 0x14b   :  { %v1199_v32 = vpop.f32.mrf.mxu0 }
 0x14d   :  { %v1200_v44 = vpop.f32.mrf.mxu0 }
 0x14e   :  { %v1201_v18 = vadd.f32 %v1200_v44, %v1199_v32 }
 0x14f   :  { %v1234_v50 = vpop.f32.mrf.mxu1 }
 0x150   :  { %v1048_v27 = vadd.f32 %v1201_v18, %v835_v62 }
 0x151   :  { %v1235_v60 = vpop.f32.mrf.mxu1 }
 0x152   :  { %v1236_v11 = vadd.f32 %v1235_v60, %v1234_v50 }
 0x154   :  { %v1118_v30 = vadd.f32 %v1236_v11, %v1048_v27 }
 0x1c4   :  { %v1143_v35 = vpop.xlane.xlu0 %1142 }
 0x1c5   :  { %v1148_v39 = vadd.f32 %v1166_v31, %v1143_v35 }
 0x1c7   :  { %1240 = vtanh.f32 %v1148_v39 }
 0x1d4   :  { %v1241_v59 = vpop.eup %1240 }
 0x1d5   :  { %1155 = vperm.xlu0 %1239, %v1241_v59  }
 0x250   :  { %v1156_v16 = vpop.permute.xlu0 %1155 }
 0x251   :  { %v1158_v40 = vsel %vm1152_vm1, %v1156_v16, 0.0 }
 0x252   :  { %v1159_v57 = vadd.f32 %v1158_v40, %v1118_v30 }
 0x254   :  { %1160 = vst [vmem:[%s2263_s4] sm:$0x3] %v1159_v57 }

</bundles_post_ra>
